<compile_context>
chip_gen: v7x
topology: tpu7x:2x2x1
jax: 0.10.0
libtpu: 0.0.40
codegen_flags: <defaults>
</compile_context>

<pallas_src>
import jax
import jax.numpy as jnp
from jax.experimental import pallas as pl
from jax.experimental.pallas import tpu as pltpu

NUM_CLASSES = 151   # hard-coded 151 in the original scatter_ call
NUM_ATTR = 200      # config.NUM_ATTR
IN_CHANNELS = 64    # in_channels (small for the example)

LANE = 128
SUBLANE = 8


def _round_up(x, m):
    return (x + m - 1) // m * m


def _attr_predictor_kernel(labels_ref, x_ref, w_feat_ref, w_cls_ref, b_ref,
                           out_ref):
    # labels_ref: (N_pad,)                int32   (SMEM, scalar-prefetched)
    # x_ref:      (TILE_N, C, H*W)        input dtype
    # w_feat_ref: (C, A_PAD)              float32 (mean scale already folded in)
    # w_cls_ref:  (NUM_CLASSES, A_PAD)    float32
    # b_ref:      (1, A_PAD)              float32
    # out_ref:    (TILE_N, A_PAD)         float32
    i = pl.program_id(0)
    tile_n = out_ref.shape[0]

    # one-hot @ W_cls  ==  row-select of W_cls by label.  Write the selected
    # row straight into the output block (it is then read-modify-written).
    def gather_row(r, carry):
        lbl = labels_ref[i * tile_n + r]
        out_ref[pl.ds(r, 1), :] = w_cls_ref[pl.ds(lbl, 1), :]
        return carry

    jax.lax.fori_loop(0, tile_n, gather_row, 0)

    # AdaptiveAvgPool2d(1): the 1/(H*W) factor lives in w_feat, so this is a
    # plain cross-lane sum over the flattened spatial axis.
    pooled = jnp.sum(x_ref[...].astype(jnp.float32), axis=-1)       # (TILE_N, C)

    out_ref[...] = (out_ref[...]
                    + jnp.dot(pooled, w_feat_ref[...],
                              preferred_element_type=jnp.float32)
                    + b_ref[...])


def prepare_attr_predictor_params(weight, bias, in_channels, spatial_size):
    """One-time static prep of nn.Linear params.

    weight: (NUM_ATTR, in_channels + NUM_CLASSES), bias: (NUM_ATTR,)
    Returns (w_feat, w_cls, bias2d) transposed, mean-scale-folded and
    lane-padded to a multiple of 128 attrs.
    """
    a_pad = _round_up(NUM_ATTR, LANE)
    pad_a = a_pad - NUM_ATTR
    w_t = weight.astype(jnp.float32).T                       # (C + 151, A)
    w_feat = w_t[:in_channels, :] * (1.0 / float(spatial_size))  # fold mean
    w_cls = w_t[in_channels:, :]                              # (151, A)
    w_feat = jnp.pad(w_feat, ((0, 0), (0, pad_a)))
    w_cls = jnp.pad(w_cls, ((0, 0), (0, pad_a)))
    b2d = jnp.pad(bias.astype(jnp.float32).reshape(1, NUM_ATTR),
                  ((0, 0), (0, pad_a)))
    return w_feat, w_cls, b2d


def attr_predictor_forward(x, label, w_feat, w_cls, b2d, *, tile_n=128):
    """x: (N, C, H, W), label: (N,) int; params from prepare_attr_predictor_params."""
    N, C, H, W = x.shape
    HW = H * W
    a_pad = w_feat.shape[1]

    # Cap the tile so a double-buffered x tile stays small vs VMEM (v7x: 64 MiB/TC).
    while tile_n > SUBLANE and tile_n * C * HW * x.dtype.itemsize > (8 << 20):
        tile_n //= 2
    tile_n = max(SUBLANE, min(tile_n, _round_up(N, SUBLANE)))
    n_pad = _round_up(N, tile_n)

    x_flat = x.reshape(N, C, HW)                 # contiguous reshape, no copy
    # NOTE: labels are clamped to [0, 150]; PyTorch scatter_ would raise on
    # out-of-range labels instead (documented divergence, keeps DMA in-bounds).
    labels = jnp.clip(label.astype(jnp.int32), 0, NUM_CLASSES - 1)
    if n_pad != N:
        x_flat = jnp.pad(x_flat, ((0, n_pad - N), (0, 0), (0, 0)))
        labels = jnp.pad(labels, (0, n_pad - N))

    out = pl.pallas_call(
        _attr_predictor_kernel,
        out_shape=jax.ShapeDtypeStruct((n_pad, a_pad), jnp.float32),
        grid_spec=pltpu.PrefetchScalarGridSpec(
            num_scalar_prefetch=1,
            grid=(n_pad // tile_n,),
            in_specs=[
                pl.BlockSpec((tile_n, C, HW), lambda i, lbl: (i, 0, 0)),
                pl.BlockSpec((C, a_pad), lambda i, lbl: (0, 0)),
                pl.BlockSpec((NUM_CLASSES, a_pad), lambda i, lbl: (0, 0)),
                pl.BlockSpec((1, a_pad), lambda i, lbl: (0, 0)),
            ],
            out_specs=pl.BlockSpec((tile_n, a_pad), lambda i, lbl: (i, 0)),
        ),
        compiler_params=pltpu.CompilerParams(
            dimension_semantics=("parallel",)),
    )(labels, x_flat, w_feat, w_cls, b2d)

    return out[:N, :NUM_ATTR]


if __name__ == "__main__":
    key = jax.random.PRNGKey(0)
    k_x, k_lbl, k_w = jax.random.split(key, 3)

    # Small but non-trivial shapes: N=20 with tile_n=8 exercises a multi-step
    # grid plus N-padding of the last tile.
    N, C, H, W = 20, IN_CHANNELS, 8, 8
    x = jax.random.normal(k_x, (N, C, H, W), dtype=jnp.float32)
    label = jax.random.randint(k_lbl, (N,), 0, NUM_CLASSES, dtype=jnp.int32)

    # nn.init.normal_(weight, mean=0, std=0.001); bias = 0
    weight = 0.001 * jax.random.normal(
        k_w, (NUM_ATTR, C + NUM_CLASSES), dtype=jnp.float32)
    bias = jnp.zeros((NUM_ATTR,), dtype=jnp.float32)

    # One-time parameter prep (split / transpose / fold mean / lane-pad).
    w_feat, w_cls, b2d = prepare_attr_predictor_params(weight, bias, C, H * W)

    attr_pred = attr_predictor_forward(x, label, w_feat, w_cls, b2d, tile_n=8)
    attr_pred = jax.block_until_ready(attr_pred)

    # Cross-check against plain JAX reference (same math as the PyTorch module).
    pooled_ref = x.reshape(N, C, H * W).mean(axis=-1)
    onehot_ref = jax.nn.one_hot(label, NUM_CLASSES, dtype=jnp.float32)
    ref = jnp.concatenate([pooled_ref, onehot_ref], axis=1) @ weight.T + bias
    assert attr_pred.shape == (N, NUM_ATTR)
    assert jnp.allclose(attr_pred, ref, atol=1e-5, rtol=1e-5)

    print("KERNEL_OK")
</pallas_src>

<mosaic_0001>
module attributes {stable_mosaic.version = 11 : i64} {
  func.func @_attr_predictor_kernel(%arg0: i32, %arg1: memref<24xi32, #tpu.memory_space<smem>>, %arg2: memref<8x64x64xf32, #tpu.memory_space<vmem>>, %arg3: memref<64x256xf32, #tpu.memory_space<vmem>>, %arg4: memref<151x256xf32, #tpu.memory_space<vmem>>, %arg5: memref<1x256xf32, #tpu.memory_space<vmem>>, %arg6: memref<8x256xf32, #tpu.memory_space<vmem>>) attributes {dimension_semantics = [#tpu.dimension_semantics<parallel>], iteration_bounds = array<i64: 3>, scalar_prefetch = 1 : i64, scratch_operands = 0 : i64, tpu.core_type = #tpu.core_type<tc>, window_params = [{transform_indices = @transform_0, window_bounds = array<i64: 8, 64, 64>}, {pipeline_mode = #tpu.pipeline_mode<synchronous>, transform_indices = @transform_1, window_bounds = array<i64: 64, 256>}, {pipeline_mode = #tpu.pipeline_mode<synchronous>, transform_indices = @transform_2, window_bounds = array<i64: 151, 256>}, {pipeline_mode = #tpu.pipeline_mode<synchronous>, transform_indices = @transform_3, window_bounds = array<i64: 1, 256>}, {transform_indices = @transform_4, window_bounds = array<i64: 8, 256>}]} {
    %c0_i32 = arith.constant 0 : i32
    %c8_i32 = arith.constant 8 : i32
    %0 = arith.addi %c0_i32, %c8_i32 : i32
    %c1_i32 = arith.constant 1 : i32
    scf.for %arg7 = %c0_i32 to %0 step %c1_i32  : i32 {
      %c8_i32_12 = arith.constant 8 : i32
      %11 = arith.muli %arg0, %c8_i32_12 : i32
      %12 = arith.addi %11, %arg7 : i32
      %13 = arith.index_cast %12 : i32 to index
      %14 = memref.load %arg1[%13] : memref<24xi32, #tpu.memory_space<smem>>
      %15 = arith.index_cast %14 : i32 to index
      %c0_13 = arith.constant 0 : index
      %16 = vector.load %arg4[%15, %c0_13] : memref<151x256xf32, #tpu.memory_space<vmem>>, vector<1x256xf32>
      %17 = arith.index_cast %arg7 : i32 to index
      %c0_14 = arith.constant 0 : index
      %18 = vector.load %arg6[%17, %c0_14] : memref<8x256xf32, #tpu.memory_space<vmem>>, vector<1x256xf32>
      tpu.vector_store %arg6[%17, %c0_14], %16 {strides = array<i32>} : memref<8x256xf32, #tpu.memory_space<vmem>>, vector<1x256xf32>,
    }
    %c8_i32_0 = arith.constant 8 : i32
    %c0 = arith.constant 0 : index
    %c0_1 = arith.constant 0 : index
    %c0_2 = arith.constant 0 : index
    %1 = vector.load %arg2[%c0, %c0_1, %c0_2] : memref<8x64x64xf32, #tpu.memory_space<vmem>>, vector<8x64x64xf32>
    %cst = arith.constant dense<0.000000e+00> : vector<8x64xf32>
    %2 = vector.multi_reduction <add>, %1, %cst [2] : vector<8x64x64xf32> to vector<8x64xf32>
    %c0_3 = arith.constant 0 : index
    %c0_4 = arith.constant 0 : index
    %3 = vector.load %arg6[%c0_3, %c0_4] : memref<8x256xf32, #tpu.memory_space<vmem>>, vector<8x256xf32>
    %c0_5 = arith.constant 0 : index
    %c0_6 = arith.constant 0 : index
    %4 = vector.load %arg3[%c0_5, %c0_6] : memref<64x256xf32, #tpu.memory_space<vmem>>, vector<64x256xf32>
    %cst_7 = arith.constant dense<0.000000e+00> : vector<8x256xf32>
    %5 = tpu.matmul %2, %4, %cst_7 {dimension_numbers = #tpu.dot_dimension_numbers<[1], [0], [0], [1], [0, 0, 1, 1], [], []>} : vector<8x64xf32>, vector<64x256xf32>, vector<8x256xf32> -> vector<8x256xf32>
    %6 = arith.addf %3, %5 : vector<8x256xf32>
    %c0_8 = arith.constant 0 : index
    %c0_9 = arith.constant 0 : index
    %7 = vector.load %arg5[%c0_8, %c0_9] : memref<1x256xf32, #tpu.memory_space<vmem>>, vector<1x256xf32>
    %8 = vector.broadcast %7 : vector<1x256xf32> to vector<8x256xf32>
    %9 = arith.addf %6, %8 : vector<8x256xf32>
    %c0_10 = arith.constant 0 : index
    %c0_11 = arith.constant 0 : index
    %10 = vector.load %arg6[%c0_10, %c0_11] : memref<8x256xf32, #tpu.memory_space<vmem>>, vector<8x256xf32>
    tpu.vector_store %arg6[%c0_10, %c0_11], %9 {strides = array<i32>} : memref<8x256xf32, #tpu.memory_space<vmem>>, vector<8x256xf32>,
    return
  }
  func.func @transform_0(%arg0: i32, %arg1: memref<24xi32, #tpu.memory_space<smem>>) -> (i32, i32, i32) {
    %c0_i32 = arith.constant 0 : i32
    %c0_i32_0 = arith.constant 0 : i32
    %c0_i32_1 = arith.constant 0 : i32
    return %arg0, %c0_i32, %c0_i32_0 : i32, i32, i32
  }
  func.func @transform_1(%arg0: i32, %arg1: memref<24xi32, #tpu.memory_space<smem>>) -> (i32, i32) {
    %c0_i32 = arith.constant 0 : i32
    %c0_i32_0 = arith.constant 0 : i32
    %c0_i32_1 = arith.constant 0 : i32
    return %c0_i32, %c0_i32_0 : i32, i32
  }
  func.func @transform_2(%arg0: i32, %arg1: memref<24xi32, #tpu.memory_space<smem>>) -> (i32, i32) {
    %c0_i32 = arith.constant 0 : i32
    %c0_i32_0 = arith.constant 0 : i32
    %c0_i32_1 = arith.constant 0 : i32
    return %c0_i32, %c0_i32_0 : i32, i32
  }
  func.func @transform_3(%arg0: i32, %arg1: memref<24xi32, #tpu.memory_space<smem>>) -> (i32, i32) {
    %c0_i32 = arith.constant 0 : i32
    %c0_i32_0 = arith.constant 0 : i32
    %c0_i32_1 = arith.constant 0 : i32
    return %c0_i32, %c0_i32_0 : i32, i32
  }
  func.func @transform_4(%arg0: i32, %arg1: memref<24xi32, #tpu.memory_space<smem>>) -> (i32, i32) {
    %c0_i32 = arith.constant 0 : i32
    %c0_i32_0 = arith.constant 0 : i32
    return %arg0, %c0_i32 : i32, i32
  }
}

</mosaic_0001>

<bundles_post_ra>
// kernel: tpu_custom_call.1
= control target key start
LH: loop header
LB: loop body
LE: loop exit
PB: predicated region body
PF: predicated region fallthrough
CT: control target
= control target key end

     0   :  { %s2086_s0 = inlined_call_operand.hbm [shape: s32[24], index: 0, kind: input, shape index: {}]   ;;  %s2087_s1 = inlined_call_operand.hbm [shape: f32[24,64,64], index: 1, kind: input, shape index: {}]   ;;  %s2088_s2 = inlined_call_operand.hbm [shape: f32[64,256], index: 2, kind: input, shape index: {}]   ;;  %s2089_s3 = inlined_call_operand.hbm [shape: f32[151,256], index: 3, kind: input, shape index: {}]   ;;  %s2090_s4 = inlined_call_operand.vmem [shape: f32[1,256], index: 4, kind: input, shape index: {}]   ;;  %s2091_s5 = inlined_call_operand.hbm [shape: f32[24,256], index: 5, kind: output, shape index: {}]  }
   0x1   :  { %s1298_s20 = scalar_lea.hbm %s2086_s0, 16 }
   0x2   :  { %p1299_p0 = scmp.ne.s32.totalorder %s2086_s0, %s1298_s20  ;;  %p1302_p1 = scmp.lt.u32.totalorder %s1298_s20, %s2086_s0 }
   0x4   :  { %p1304_p2 = pnand %p1302_p1, %p1299_p0 }
   0x6   :  { %1307 = shalt.err (!%p1304_p2)  }
   0x7   :  { %s1476_s25 = smov [#allocation3]  }
   0x8   :  { %11 = dma.hbm_to_smem %s2086_s0, 16, %s1476_s25, [#allocation2] }
   0x9   :  { %1442 = dma.done.wait [#allocation2], 16 }
   0xa   :  { %1443 = vsyncadd [#allocation2], 4294967280 }
   0xb   :  { %13 = sfence }
   0xc   :  { %14 = vsyncpa [#allocation5], 0 }
   0xd   :  { %16 = vsyncpa [#allocation5 + $0x1], 0 }
   0xe   :  { %17 = vsyncpa [#allocation8], 0 }
   0xf   :  { %18 = vsyncpa [#allocation6], 0 }
  0x10   :  { %20 = vsyncpa [#allocation6 + $0x1], 0  ;;  %s1528_s28 = smov 0   ;;  %s1530_s29 = smov 0  }
  0x11   :  { %s1532_s30 = smov 0   ;;  %s1534_s6 = smov 0  }
  0x12 LB: > { %s1549_s0 = sadd.s32 4294967295, %s1470_s6   ;;  %s1171_s7 = sadd.s32 4294967294, %s1470_s6   ;;  %s1470_s6 = sphi %s1534_s6, %s2110_s6   ;;  %s1466_s30 = sphi %s1532_s30, %s2109_s30   ;;  %s1462_s29 = sphi %s1530_s29, %s2108_s29   ;;  %s1458_s28 = sphi %s1528_s28, %s2107_s28  }
  0x13   : > { %p46_p3 = scmp.ne.s32.totalorder %s1462_s29, %s1458_s28  ;;  %p2092_p4 = scmp.eq.s32.totalorder %s1549_s0, 0 }
  0x14   : > { %p139_p6 = scmp.eq.s32.totalorder %s1171_s7, 2  ;;  %p1172_p8 = scmp.ge.s32.totalorder %s1470_s6, 1 }
  0x15   : > { %p1558_p7 = por %p2092_p4, %p46_p3  ;;  %p146_p10 = scmp.lt.s32.totalorder %s1470_s6, 4 }
  0x16   : > { %p1563_p9 = por %p139_p6, %p46_p3  ;;  %s1477_s11 = smov [#allocation7]  }
  0x17   : > { %s2095_s8 = scalar_select %p1558_p7, 1, 0 }
  0x18   : > { %s2096_s9 = scalar_select %p1563_p9, 1, 0 }
  0x19   : > { %p1568_p11 = pnand %p1172_p8, %p146_p10  ;;  %s158_s12 = sshll.u32 %s1477_s11, 4  ;;  %s159_s12 = int_to_ptr.vmem [resolvable:$true] %s158_s12 }
  0x1a   : > { %s1478_s14 = smov [#allocation9]   ;;  %s1308_s18 = scalar_lea.hbm %s2088_s2, 2048 }
  0x1b   : > { %s2097_s10 = scalar_select %p1568_p11, 1, 0 }
  0x1c   : > { %p1229_p12 = pneg %p1568_p11  ;;  %s171_s15 = sshll.u32 %s1478_s14, 4  ;;  %s1580_s15 = int_to_ptr.vmem [resolvable:$true] %s171_s15 }
  0x1d   : > { %p1309_p0 = scmp.ne.s32.totalorder %s2088_s2, %s1308_s18  ;;  %p1315_p6 = scmp.lt.u32.totalorder %s1308_s18, %s2088_s2 }
  0x1e   : > { %p1576_p13 = pnand %p1229_p12, %p2092_p4 }
  0x20   : > { %p1310_p1 = pneg %p1576_p13 }
  0x22   : > { %p1311_p2 = pnand %p1310_p1, %p1309_p0 }
  0x24   : > { %p1312_p3 = pneg %p1311_p2 }
  0x26   : > { %p1317_p8 = pnand %p1315_p6, %p1312_p3 }
  0x28   : > { %1320 = shalt.err (!%p1317_p8)
}
  0x29   : > { %s1321_s23 = scalar_lea.vmem %s159_s12, 2048  ;;  %p1329_p5 = scmp.lt.s32.totalorder %s159_s12, %s159_s12 }
  0x2a   : > { %p1322_p10 = scmp.ne.s32.totalorder %s159_s12, %s1321_s23  ;;  %p1330_p9 = scmp.lt.s32.totalorder %s1321_s23, %s1321_s23 }
  0x2c   : > { %p1324_p12 = pnand %p1322_p10, %p1310_p1  ;;  %p1331_p7 = por %p1330_p9, %p1329_p5 }
  0x2e   : > { %p1325_p4 = pneg %p1324_p12 }
  0x30   : > { %p1332_p11 = pnand %p1331_p7, %p1325_p4 }
  0x32   : > { %1335 = shalt.err (!%p1332_p11)
}
  0x33   : > { %s1479_s24 = smov 256   ;;  %s1480_s25 = smov 16  }
  0x34   : > { %1232 = dma.hbm_to_vmem [thread:$0]  (!%p1576_p13), %s2088_s2, 2048, %s159_s12, [#allocation8], %s1479_s24, %s1479_s24, %s1480_s25  }
  0x35   : > { %s1336_s14 = scalar_lea.hbm %s2089_s3, 4864 }
  0x36   : > { %p1337_p0 = scmp.ne.s32.totalorder %s2089_s3, %s1336_s14  ;;  %p1343_p7 = scmp.lt.u32.totalorder %s1336_s14, %s2089_s3 }
  0x38   : > { %p1339_p4 = pnand %p1337_p0, %p1310_p1 }
  0x3a   : > { %p1340_p5 = pneg %p1339_p4 }
  0x3c   : > { %p1345_p9 = pnand %p1343_p7, %p1340_p5 }
  0x3e   : > { %1348 = shalt.err (!%p1345_p9)
}
  0x3f   : > { %s1349_s12 = scalar_lea.vmem %s1580_s15, 4864  ;;  %p1357_p6 = scmp.lt.s32.totalorder %s1580_s15, %s1580_s15 }
  0x40   : > { %p1350_p11 = scmp.ne.s32.totalorder %s1580_s15, %s1349_s12  ;;  %p1358_p8 = scmp.lt.s32.totalorder %s1349_s12, %s1349_s12 }
  0x42   : > { %p1352_p2 = pnand %p1350_p11, %p1310_p1  ;;  %p1359_p10 = por %p1358_p8, %p1357_p6 }
  0x44   : > { %p1353_p3 = pneg %p1352_p2 }
  0x46   : > { %p1360_p12 = pnand %p1359_p10, %p1353_p3 }
  0x48   : > { %1363 = shalt.err (!%p1360_p12)
}
  0x49   : > { %1235 = dma.hbm_to_vmem [thread:$0]  (!%p1576_p13), %s2089_s3, 4864, %s1580_s15, [#allocation8], %s1479_s24, %s1479_s24, %s1480_s25  }
  0x4a   : > { %s1630_s22 = sadd.s32 1, %s1470_s6   ;;  %s33_s13 = sadd.s32 1, %s1466_s30 }
  0x4b   : > { %s30_s23 = ssub.s32 %s1470_s6, %s1630_s22  ;;  %p40_p1 = scmp.ne.s32.totalorder %s1466_s30, %s1462_s29 }
  0x4c   : > { %p31_p0 = scmp.eq.s32.totalorder %s30_s23, 0  ;;  %p41_p4 = scmp.eq.s32.totalorder %s1470_s6, 0 }
  0x4d   : > { %p2099_p5 = scmp.eq.s32.totalorder %s1549_s0, 2  ;;  %p1246_p9 = scmp.lt.s32.totalorder %s1470_s6, 3 }
  0x4e   : > { %s1646_s27 = scalar_select %p31_p0, %s1466_s30, %s33_s13  }
  0x4f   : > { %p1640_p7 = por %p2099_p5, %p40_p1  ;;  %p42_p11 = por %p41_p4, %p40_p1 }
  0x50   : > { %s188_s7 = sand.u32 1, %s1466_s30   ;;  %s1197_s15 = sshll.u32 %s1470_s6, 13 }
  0x51   : > { %s1176_s11 = sshll.u32 %s188_s7, 9  ;;  %s1653_s14 = scalar_lea.hbm %s2087_s1, %s1197_s15 }
  0x52   : > { %s192_s16 = scalar_lea.vmem [#allocation4], %s1176_s11  ;;  %p1657_p13 = pnand %p1246_p9, %p42_p11 }
  0x53   : > { %s200_s17 = sshll.u32 %s192_s16, 4  ;;  %s1661_s19 = scalar_lea.sflag [#allocation5], %s188_s7  ;;  %s1655_s17 = int_to_ptr.vmem [resolvable:$true] %s200_s17 }
  0x54   : > { %s1364_s12 = scalar_lea.hbm %s1653_s14, 8192  ;;  %p1366_p3 = pneg %p1657_p13 }
  0x55   : > { %p1365_p2 = scmp.ne.s32.totalorder %s1653_s14, %s1364_s12  ;;  %s1369_s13 = scalar_lea.hbm %s2087_s1, 24576 }
  0x56   : > { %p1370_p10 = scmp.lt.u32.totalorder %s1653_s14, %s2087_s1  ;;  %p1371_p12 = scmp.lt.u32.totalorder %s1369_s13, %s1364_s12 }
  0x57   : > { %p1367_p6 = pnand %p1366_p3, %p1365_p2  ;;  %p1373_p0 = scmp.lt.u32.totalorder %s1364_s12, %s1653_s14 }
  0x58   : > { %p1372_p1 = por %p1371_p12, %p1370_p10 }
  0x59   : > { %p1368_p8 = pneg %p1367_p6 }
  0x5a   : > { %p1374_p4 = por %p1373_p0, %p1372_p1 }
  0x5c   : > { %p1375_p5 = pnand %p1374_p4, %p1368_p8 }
  0x5e   : > { %1378 = shalt.err (!%p1375_p5)
}
  0x5f   : > { %s1379_s7 = scalar_lea.vmem %s1655_s17, 8192  ;;  %s1481_s15 = smov [#allocation4]  }
  0x60   : > { %p1380_p9 = scmp.ne.s32.totalorder %s1655_s17, %s1379_s7  ;;  %s1384_s24 = sshll.u32 %s1481_s15, 4  ;;  %s1385_s24 = int_to_ptr.vmem [resolvable:$false] %s1384_s24 }
  0x61   : > { %s1386_s25 = scalar_lea.vmem %s1385_s24, 16384  ;;  %p1387_p6 = scmp.lt.s32.totalorder %s1655_s17, %s1385_s24 }
  0x62   : > { %p1382_p11 = pnand %p1380_p9, %p1366_p3  ;;  %p1388_p10 = scmp.lt.s32.totalorder %s1386_s25, %s1379_s7 }
  0x64   : > { %p1383_p2 = pneg %p1382_p11  ;;  %p1389_p12 = por %p1388_p10, %p1387_p6 }
  0x66   : > { %p1390_p1 = pnand %p1389_p12, %p1383_p2 }
  0x68   : > { %1393 = shalt.err (!%p1390_p1)
}
  0x69   : > { %s1482_s16 = smov 128   ;;  %s1483_s12 = smov 8  }
  0x6a   : > { %1239 = dma.hbm_to_vmem [thread:$0]  (!%p1657_p13), %s1653_s14, 8192, %s1655_s17, %s1661_s19, %s1482_s16, %s1482_s16, %s1483_s12  }
  0x6b   : > { %p2102_p3 = scmp.ne.s32.totalorder %s2097_s10, 0 }
  0x6c   : > { %s1692_s20 = sand.u32 (!%p2102_p3), 1, %s1462_s29   ;;  %p2103_p8 = scmp.ne.s32.totalorder (!%p2102_p3), %s2095_s8, 0 }
  0x6d   : > { %212 = sbr.rel (%p2102_p3) target bundleno = 632 (0x278), region = 36  ;;  %s1181_s21 = sshll.u32 (!%p2102_p3), %s1692_s20, 9 }
  0x6e   : > { %s215_s13 = scalar_lea.sflag (!%p2102_p3), [#allocation5], %s1692_s20  ;;  %s1696_s23 = scalar_lea.vmem (!%p2102_p3), [#allocation4], %s1181_s21 }
  0x74   : > { %1445 = dma.done.wait (%p2103_p8), %s215_s13, 8192  }
  0x75   : > { %1447 = vsyncadd (%p2103_p8), %s215_s13, 4294959104  ;;  %p2104_p13 = scmp.eq.s32.totalorder %s1549_s0, 0 }
  0x77   : > { %1449 = dma.done.wait (%p2104_p13), [#allocation8], 6912   ;;  %p2105_p0 = pmov %p2104_p13 }
  0x78   : > { %s1184_s10 = sshll.u32 %s1692_s20, 4  ;;  %s1472_s17 = smov 0  }
  0x79   : > { %1451 = vsyncadd (%p2105_p0), [#allocation8], 4294960384  ;;  %s1707_s14 = scalar_lea.vmem [#allocation10], %s1184_s10 }
  0x7a LB: >> { %s1185_s18 = sshll.u32 %s1549_s0, 3  ;;  %s274_s8 = sshra.s32 %s1474_s17, 3  ;;  %v270_v0 = vlaneseq  ;;  %s1474_s17 = sphi %s1472_s17, %s257_s17  }
  0x7b   : >> { %s259_s19 = sadd.s32 %s1474_s17, %s1185_s18  ;;  %s277_s7 = sand.u32 7, %s1474_s17 }
  0x7c   : >> { %s260_s11 = sld [smem:[#allocation3 + %s259_s19]]  ;;  %s1199_s15 = sshll.u32 %s274_s8, 4  ;;  %vm272_vm0 = vcmp.lt.s32.totalorder %v270_v0, 256 }
  0x7d   : >> { %s280_s24 = sadd.s32 %s1199_s15, %s277_s7  ;;  %s257_s17 = sadd.s32 1, %s1474_s17  }
  0x7e   : >> { %s281_s13 = scalar_lea.vmem %s1707_s14, %s280_s24 [#allocation10]  ;;  %p254_p4 = scmp.ge.s32.totalorder %s257_s17, 8  }
  0x7f   : > { %v292_v2 = vld [vmem:[%s1696_s23 + $0x40] sm:$0xff] (%p254_p4)  ;;  %vm348_vm1 = vcmask (%p254_p4), 523264   ;;  %v293_v4 = vld [vmem:[%s1696_s23 + $0x48] sm:$0xff] (%p254_p4)  ;;  %v294_v10 = vld [vmem:[%s1696_s23 + $0x50] sm:$0xff] (%p254_p4)  ;;  %vm634_vm2 = vcmask (%p254_p4), 130112   ;;  %vm641_vm3 = vcmask (%p254_p4), 195712  }
  0x80   : > { %v284_v3 = vld [vmem:[%s1696_s23] sm:$0xff] (%p254_p4)  ;;  %v373_v5 = vsel (%p254_p4), %vm348_vm1, %v292_v2, 0.0  ;;  %v285_v7 = vld [vmem:[%s1696_s23 + $0x8] sm:$0xff] (%p254_p4)  ;;  %v376_v8 = vsel (%p254_p4), %vm348_vm1, %v293_v4, 0.0  ;;  %v286_v11 = vld [vmem:[%s1696_s23 + $0x10] sm:$0xff] (%p254_p4)  ;;  %v379_v12 = vsel (%p254_p4), %vm348_vm1, %v294_v10, 0.0 }
  0x81   : > { %256 = sbr.rel (!%p254_p4) target bundleno = 122 (0x7a), region = 98  ;;  %v349_v6 = vsel (%p254_p4), %vm348_vm1, %v284_v3, 0.0  ;;  %374 = vadd.xlane.f32.xlu1 (%p254_p4), %v373_v5  ;;  %v352_v9 = vsel (%p254_p4), %vm348_vm1, %v285_v7, 0.0  ;;  %v355_v13 = vsel (%p254_p4), %vm348_vm1, %v286_v11, 0.0  ;;  %v301_v14 = vld [vmem:[%s1696_s23 + $0x88] sm:$0xff] (%p254_p4)  ;;  %v300_v15 = vld [vmem:[%s1696_s23 + $0x80] sm:$0xff] (%p254_p4) }
  0x82   : >> { %s261_s25 = sshra.s32 %s260_s11, 3  ;;  %s264_s16 = sand.u32 7, %s260_s11  ;;  %350 = vadd.xlane.f32.xlu0 (%p254_p4), %v349_v6  ;;  %v400_v16 = vsel (%p254_p4), %vm348_vm1, %v301_v14, 0.0  ;;  %v397_v17 = vsel (%p254_p4), %vm348_vm1, %v300_v15, 0.0  ;;  %v295_v18 = vld [vmem:[%s1696_s23 + $0x58] sm:$0xff] (%p254_p4)  ;;  %v308_v22 = vld [vmem:[%s1696_s23 + $0xc0] sm:$0xff] (%p254_p4) }
  0x83   : >> { %s1198_s12 = sshll.u32 %s261_s25, 4  ;;  %v287_v19 = vld [vmem:[%s1696_s23 + $0x18] sm:$0xff] (%p254_p4)  ;;  %v382_v20 = vsel (%p254_p4), %vm348_vm1, %v295_v18, 0.0  ;;  %v302_v23 = vld [vmem:[%s1696_s23 + $0x90] sm:$0xff] (%p254_p4)  ;;  %v421_v24 = vsel (%p254_p4), %vm348_vm1, %v308_v22, 0.0  ;;  %v288_v26 = vld [vmem:[%s1696_s23 + $0x20] sm:$0xff] (%p254_p4) }
  0x84   : >> { %s267_s21 = sadd.s32 %s1198_s12, %s264_s16  ;;  %v358_v21 = vsel (%p254_p4), %vm348_vm1, %v287_v19, 0.0  ;;  %v403_v25 = vsel (%p254_p4), %vm348_vm1, %v302_v23, 0.0  ;;  %v309_v27 = vld [vmem:[%s1696_s23 + $0xc8] sm:$0xff] (%p254_p4)  ;;  %v361_v28 = vsel (%p254_p4), %vm348_vm1, %v288_v26, 0.0  ;;  %v303_v30 = vld [vmem:[%s1696_s23 + $0x98] sm:$0xff] (%p254_p4)  ;;  %v296_v31 = vld [vmem:[%s1696_s23 + $0x60] sm:$0xff] (%p254_p4) }
  0x85   : >> { %s268_s10 = scalar_lea.vmem [#allocation9], %s267_s21  ;;  %377 = vadd.xlane.f32.xlu1 (%p254_p4), %v376_v8  ;;  %v424_v29 = vsel (%p254_p4), %vm348_vm1, %v309_v27, 0.0  ;;  %v406_v32 = vsel (%p254_p4), %vm348_vm1, %v303_v30, 0.0  ;;  %v385_v33 = vsel (%p254_p4), %vm348_vm1, %v296_v31, 0.0  ;;  %v316_v34 = vld [vmem:[%s1696_s23 + $0x100] sm:$0xff] (%p254_p4)  ;;  %v310_v35 = vld [vmem:[%s1696_s23 + $0xd0] sm:$0xff] (%p254_p4) }
  0x86   : >> { %v269_v1 = vld [vmem:[%s268_s10] ss:$8 sm:$0x3]  ;;  %353 = vadd.xlane.f32.xlu0 (%p254_p4), %v352_v9  ;;  %v445_v36 = vsel (%p254_p4), %vm348_vm1, %v316_v34, 0.0  ;;  %v427_v37 = vsel (%p254_p4), %vm348_vm1, %v310_v35, 0.0  ;;  %v289_v38 = vld [vmem:[%s1696_s23 + $0x28] sm:$0xff] (%p254_p4) }
  0x87   : >> { %282 = vst.msk [vmem:[%s281_s13] ss:$8 sm:$0x3] %vm272_vm0, %v269_v1  ;;  %v317_v39 = vld [vmem:[%s1696_s23 + $0x108] sm:$0xff] (%p254_p4)  ;;  %v364_v40 = vsel (%p254_p4), %vm348_vm1, %v289_v38, 0.0  ;;  %v304_v42 = vld [vmem:[%s1696_s23 + $0xa0] sm:$0xff] (%p254_p4) }
  0x88   : > { %v448_v41 = vsel %vm348_vm1, %v317_v39, 0.0  ;;  %v297_v43 = vld [vmem:[%s1696_s23 + $0x68] sm:$0xff]  ;;  %v409_v44 = vsel %vm348_vm1, %v304_v42, 0.0  ;;  %v318_v46 = vld [vmem:[%s1696_s23 + $0x110] sm:$0xff]  ;;  %v311_v47 = vld [vmem:[%s1696_s23 + $0xd8] sm:$0xff]  ;;  %vm648_vm4 = vcmask 261312  }
  0x89   : > { %380 = vadd.xlane.f32.xlu1 %v379_v12  ;;  %v388_v45 = vsel %vm348_vm1, %v297_v43, 0.0  ;;  %v451_v48 = vsel %vm348_vm1, %v318_v46, 0.0  ;;  %v430_v49 = vsel %vm348_vm1, %v311_v47, 0.0  ;;  %v325_v50 = vld [vmem:[%s1696_s23 + $0x148] sm:$0xff]  ;;  %v324_v51 = vld [vmem:[%s1696_s23 + $0x140] sm:$0xff]  ;;  %v298_v54 = vld [vmem:[%s1696_s23 + $0x70] sm:$0xff] }
  0x8a   : > { %356 = vadd.xlane.f32.xlu0 %v355_v13  ;;  %v472_v52 = vsel %vm348_vm1, %v325_v50, 0.0  ;;  %v469_v53 = vsel %vm348_vm1, %v324_v51, 0.0  ;;  %v290_v55 = vld [vmem:[%s1696_s23 + $0x30] sm:$0xff]  ;;  %v391_v56 = vsel %vm348_vm1, %v298_v54, 0.0  ;;  %v312_v58 = vld [vmem:[%s1696_s23 + $0xe0] sm:$0xff]  ;;  %v305_v59 = vld [vmem:[%s1696_s23 + $0xa8] sm:$0xff] }
  0x8b   : > { %v367_v57 = vsel %vm348_vm1, %v290_v55, 0.0  ;;  %v433_v60 = vsel %vm348_vm1, %v312_v58, 0.0  ;;  %v412_v61 = vsel %vm348_vm1, %v305_v59, 0.0  ;;  %v326_v62 = vld [vmem:[%s1696_s23 + $0x150] sm:$0xff]  ;;  %v319_v63 = vld [vmem:[%s1696_s23 + $0x118] sm:$0xff]  ;;  %v333_v3 = vld [vmem:[%s1696_s23 + $0x188] sm:$0xff] }
  0x8c   : > { %v475_v1 = vsel %vm348_vm1, %v326_v62, 0.0  ;;  %v454_v2 = vsel %vm348_vm1, %v319_v63, 0.0  ;;  %v332_v4 = vld [vmem:[%s1696_s23 + $0x180] sm:$0xff]  ;;  %v496_v5 = vsel %vm348_vm1, %v333_v3, 0.0  ;;  %v299_v7 = vld [vmem:[%s1696_s23 + $0x78] sm:$0xff]  ;;  %v313_v11 = vld [vmem:[%s1696_s23 + $0xe8] sm:$0xff] }
  0x8d   : > { %401 = vadd.xlane.f32.xlu1 %v400_v16  ;;  %v493_v6 = vsel %vm348_vm1, %v332_v4, 0.0  ;;  %v291_v8 = vld [vmem:[%s1696_s23 + $0x38] sm:$0xff]  ;;  %v394_v9 = vsel %vm348_vm1, %v299_v7, 0.0  ;;  %v306_v12 = vld [vmem:[%s1696_s23 + $0xb0] sm:$0xff]  ;;  %v436_v13 = vsel %vm348_vm1, %v313_v11, 0.0  ;;  %v320_v16 = vld [vmem:[%s1696_s23 + $0x120] sm:$0xff] }
  0x8e   : > { %398 = vadd.xlane.f32.xlu0 %v397_v17  ;;  %v370_v10 = vsel %vm348_vm1, %v291_v8, 0.0  ;;  %v415_v14 = vsel %vm348_vm1, %v306_v12, 0.0  ;;  %v327_v15 = vld [vmem:[%s1696_s23 + $0x158] sm:$0xff]  ;;  %v457_v18 = vsel %vm348_vm1, %v320_v16, 0.0  ;;  %v340_v19 = vld [vmem:[%s1696_s23 + $0x1c0] sm:$0xff]  ;;  %v321_v27 = vld [vmem:[%s1696_s23 + $0x128] sm:$0xff] }
  0x8f   : > { %v478_v17 = vsel %vm348_vm1, %v327_v15, 0.0  ;;  %v307_v23 = vld [vmem:[%s1696_s23 + $0xb8] sm:$0xff]  ;;  %v329_v39 = vld [vmem:[%s1696_s23 + $0x168] sm:$0xff]  ;;  %v330_v47 = vld [vmem:[%s1696_s23 + $0x170] sm:$0xff]  ;;  %vm655_vm5 = vcmask 326912   ;;  %vm662_vm6 = vcmask 392512  }
  0x90   : > { %v335_v31 = vld [vmem:[%s1696_s23 + $0x198] sm:$0xff]  ;;  %v344_v51 = vld [vmem:[%s1696_s23 + $0x1e0] sm:$0xff]  ;;  %v338_v55 = vld [vmem:[%s1696_s23 + $0x1b0] sm:$0xff]  ;;  %vm669_vm7 = vcmask 458112   ;;  %vm676_vm8 = vcmask 523712   ;;  %vm951_vm9 = vcmask 1041409  }
  0x91   : > { %383 = vadd.xlane.f32.xlu1 %v382_v20  ;;  %v334_v20 = vld [vmem:[%s1696_s23 + $0x190] sm:$0xff]  ;;  %v315_v35 = vld [vmem:[%s1696_s23 + $0xf8] sm:$0xff]  ;;  %v544_v4 = vld [vmem:[#allocation7 + $0x8] sm:$0xff]  ;;  %vm953_vm10 = vcmask 1042434   ;;  %vm955_vm11 = vcmask 1043459   ;;  %vm957_vm12 = vcmask 1044484  }
  0x92   : > { %359 = vadd.xlane.f32.xlu0 %v358_v21  ;;  %v517_v21 = vsel %vm348_vm1, %v340_v19, 0.0  ;;  %v499_v22 = vsel %vm348_vm1, %v334_v20, 0.0  ;;  %v343_v43 = vld [vmem:[%s1696_s23 + $0x1d8] sm:$0xff]  ;;  %v346_v63 = vld [vmem:[%s1696_s23 + $0x1f0] sm:$0xff]  ;;  %v543_v7 = vld [vmem:[#allocation7] sm:$0xff]  ;;  %vm959_vm13 = vcmask 1045509  }
  0x93   : > { %v339_v59 = vld [vmem:[%s1696_s23 + $0x1b8] sm:$0xff]  ;;  %v545_v8 = vld [vmem:[#allocation7 + $0x10] sm:$0xff]  ;;  %v552_v16 = vld [vmem:[#allocation7 + $0x48] sm:$0xff]  ;;  %vm961_vm14 = vcmask 1046534   ;;  %vm963_vm15 = vcmask 1047559   ;;  %s1200_s18 = sshll.u32 %s1549_s0, 8 }
  0x94   : > { %v550_v11 = vld [vmem:[#allocation7 + $0x38] sm:$0xff]  ;;  %v551_v19 = vld [vmem:[#allocation7 + $0x40] sm:$0xff]  ;;  %v553_v20 = vld [vmem:[#allocation7 + $0x50] sm:$0xff]  ;;  %s1071_s19 = sshll.u32 %s1707_s14, 4  ;;  %s2041_s7 = scalar_lea.hbm %s2091_s5, %s1200_s18  ;;  %s2043_s19 = int_to_ptr.vmem [resolvable:$true] %s1071_s19 }
  0x95   : > { %422 = vadd.xlane.f32.xlu1 %v421_v24  ;;  %v341_v24 = vld [vmem:[%s1696_s23 + $0x1c8] sm:$0xff]  ;;  %s1057_s15 = scalar_lea.sflag [#allocation6], %s1692_s20  ;;  %s1394_s24 = scalar_lea.vmem %s2043_s19, 256 }
  0x96   : > { %404 = vadd.xlane.f32.xlu0 %v403_v25  ;;  %v418_v25 = vsel %vm348_vm1, %v307_v23, 0.0  ;;  %v520_v26 = vsel %vm348_vm1, %v341_v24, 0.0  ;;  %v556_v23 = vld [vmem:[#allocation7 + $0x68] sm:$0xff]  ;;  %v558_v24 = vld [vmem:[#allocation7 + $0x78] sm:$0xff]  ;;  %p1395_p5 = scmp.ne.s32.totalorder %s2043_s19, %s1394_s24  ;;  %s1485_s0 = smov [#allocation10]  }
  0x97   : > { %s1398_s25 = sshll.u32 %s1485_s0, 4  ;;  %s1399_s25 = int_to_ptr.vmem [resolvable:$false] %s1398_s25 }
  0x98   : > { %p1396_p9 = pnand %p1395_p5, %p1640_p7  ;;  %s1400_s16 = scalar_lea.vmem %s1399_s25, 512 }
  0x99   : > { %362 = vadd.xlane.f32.xlu1 %v361_v28  ;;  %v314_v28 = vld [vmem:[%s1696_s23 + $0xf0] sm:$0xff]  ;;  %p1401_p2 = scmp.lt.s32.totalorder %s2043_s19, %s1399_s25  ;;  %p1402_p6 = scmp.lt.s32.totalorder %s1400_s16, %s1394_s24 }
  0x9a   : > { %425 = vadd.xlane.f32.xlu0 %v424_v29  ;;  %v460_v29 = vsel %vm348_vm1, %v321_v27, 0.0  ;;  %v439_v30 = vsel %vm348_vm1, %v314_v28, 0.0  ;;  %v557_v27 = vld [vmem:[#allocation7 + $0x70] sm:$0xff]  ;;  %v1844_v28 = vshrl.u32 %v270_v0, 7  ;;  %p1397_p11 = pneg %p1396_p9 }
  0x9b   : > { %p1403_p10 = por %p1402_p6, %p1401_p2 }
  0x9d   : > { %407 = vadd.xlane.f32.xlu1 %v406_v32  ;;  %v328_v32 = vld [vmem:[%s1696_s23 + $0x160] sm:$0xff]  ;;  %p1404_p12 = pnand %p1403_p10, %p1397_p11 }
  0x9e   : > { %386 = vadd.xlane.f32.xlu0 %v385_v33  ;;  %v502_v33 = vsel %vm348_vm1, %v335_v31, 0.0  ;;  %v481_v34 = vsel %vm348_vm1, %v328_v32, 0.0 }
  0xa1   : > { %446 = vadd.xlane.f32.xlu1 %v445_v36  ;;  %v342_v36 = vld [vmem:[%s1696_s23 + $0x1d0] sm:$0xff] }
  0xa2   : > { %428 = vadd.xlane.f32.xlu0 %v427_v37  ;;  %v442_v37 = vsel %vm348_vm1, %v315_v35, 0.0  ;;  %v523_v38 = vsel %vm348_vm1, %v342_v36, 0.0  ;;  %v1484_v36 = vmov 0.0  }
  0xa3   : > { %1031 = vmatprep.mubr.f32.mxu0 %v1484_v36 }
  0xa5   : > { %365 = vadd.xlane.f32.xlu1 %v364_v40  ;;  %v322_v40 = vld [vmem:[%s1696_s23 + $0x130] sm:$0xff] }
  0xa6   : > { %449 = vadd.xlane.f32.xlu0 %v448_v41  ;;  %v484_v41 = vsel %vm348_vm1, %v329_v39, 0.0  ;;  %v463_v42 = vsel %vm348_vm1, %v322_v40, 0.0 }
  0xa9   : > { %410 = vadd.xlane.f32.xlu1 %v409_v44  ;;  %v336_v44 = vld [vmem:[%s1696_s23 + $0x1a0] sm:$0xff] }
  0xaa   : > { %389 = vadd.xlane.f32.xlu0 %v388_v45  ;;  %v526_v45 = vsel %vm348_vm1, %v343_v43, 0.0  ;;  %v505_v46 = vsel %vm348_vm1, %v336_v44, 0.0 }
  0xad   : > { %452 = vadd.xlane.f32.xlu1 %v451_v48  ;;  %v323_v48 = vld [vmem:[%s1696_s23 + $0x138] sm:$0xff] }
  0xae   : > { %431 = vadd.xlane.f32.xlu0 %v430_v49  ;;  %v487_v49 = vsel %vm348_vm1, %v330_v47, 0.0  ;;  %v466_v50 = vsel %vm348_vm1, %v323_v48, 0.0 }
  0xb1   : > { %473 = vadd.xlane.f32.xlu1 %v472_v52  ;;  %v337_v52 = vld [vmem:[%s1696_s23 + $0x1a8] sm:$0xff] }
  0xb2   : > { %470 = vadd.xlane.f32.xlu0 %v469_v53  ;;  %v529_v53 = vsel %vm348_vm1, %v344_v51, 0.0  ;;  %v508_v54 = vsel %vm348_vm1, %v337_v52, 0.0 }
  0xb5   : > { %392 = vadd.xlane.f32.xlu1 %v391_v56  ;;  %v331_v56 = vld [vmem:[%s1696_s23 + $0x178] sm:$0xff] }
  0xb6   : > { %368 = vadd.xlane.f32.xlu0 %v367_v57  ;;  %v511_v57 = vsel %vm348_vm1, %v338_v55, 0.0  ;;  %v490_v58 = vsel %vm348_vm1, %v331_v56, 0.0 }
  0xb9   : > { %434 = vadd.xlane.f32.xlu1 %v433_v60  ;;  %v345_v60 = vld [vmem:[%s1696_s23 + $0x1e8] sm:$0xff] }
  0xba   : > { %413 = vadd.xlane.f32.xlu0 %v412_v61  ;;  %v514_v61 = vsel %vm348_vm1, %v339_v59, 0.0  ;;  %v532_v62 = vsel %vm348_vm1, %v345_v60, 0.0 }
  0xbd   : > { %476 = vadd.xlane.f32.xlu1 %v475_v1  ;;  %v347_v1 = vld [vmem:[%s1696_s23 + $0x1f8] sm:$0xff] }
  0xbe   : > { %455 = vadd.xlane.f32.xlu0 %v454_v2  ;;  %v535_v2 = vsel %vm348_vm1, %v346_v63, 0.0  ;;  %v538_v3 = vsel %vm348_vm1, %v347_v1, 0.0 }
  0xc1   : > { %497 = vadd.xlane.f32.xlu1 %v496_v5  ;;  %v546_v5 = vld [vmem:[#allocation7 + $0x18] sm:$0xff] }
  0xc2   : > { %494 = vadd.xlane.f32.xlu0 %v493_v6  ;;  %v1201_v6 = vpack.c.bf16 %v546_v5, %v544_v4 }
  0xc4   : > { %1202 = vmatprep.subr.bf16.mxu0 %v1201_v6 }
  0xc5   : > { %395 = vadd.xlane.f32.xlu1 %v394_v9  ;;  %v1203_v9 = vpack.c.bf16 %v545_v8, %v543_v7 }
  0xc6   : > { %371 = vadd.xlane.f32.xlu0 %v370_v10  ;;  %v548_v10 = vld [vmem:[#allocation7 + $0x28] sm:$0xff] }
  0xc7   : > { %1204 = vmatpush1.bf16.msra.mxu0 %v1203_v9  ;;  %v1205_v12 = vpack.c.bf16 %v550_v11, %v548_v10 }
  0xc9   : > { %437 = vadd.xlane.f32.xlu1 %v436_v13  ;;  %v547_v13 = vld [vmem:[#allocation7 + $0x20] sm:$0xff]  ;;  %1206 = vmatprep.subr.bf16.mxu0 %v1205_v12 }
  0xca   : > { %416 = vadd.xlane.f32.xlu0 %v415_v14  ;;  %v549_v14 = vld [vmem:[#allocation7 + $0x30] sm:$0xff] }
  0xcb   : > { %v1207_v15 = vpack.c.bf16 %v549_v14, %v547_v13 }
  0xcd   : > { %479 = vadd.xlane.f32.xlu1 %v478_v17  ;;  %1208 = vmatpush1.bf16.msra.mxu0 %v1207_v15  ;;  %v554_v17 = vld [vmem:[#allocation7 + $0x58] sm:$0xff] }
  0xce   : > { %458 = vadd.xlane.f32.xlu0 %v457_v18  ;;  %v1209_v18 = vpack.c.bf16 %v554_v17, %v552_v16 }
  0xd0   : > { %1210 = vmatprep.subr.bf16.mxu0 %v1209_v18 }
  0xd1   : > { %518 = vadd.xlane.f32.xlu1 %v517_v21  ;;  %v1211_v21 = vpack.c.bf16 %v553_v20, %v551_v19 }
  0xd2   : > { %500 = vadd.xlane.f32.xlu0 %v499_v22  ;;  %v1841_v22 = vand.u32 127, %v270_v0 }
  0xd3   : > { %1212 = vmatpush1.bf16.msra.mxu0 %v1211_v21 }
  0xd4   : > { %v657_v18 = vadd.s32 4294967256, %v1841_v22 }
  0xd5   : > { %419 = vadd.xlane.f32.xlu1 %v418_v25  ;;  %v1213_v25 = vpack.c.bf16 %v558_v24, %v556_v23 }
  0xd6   : > { %521 = vadd.xlane.f32.xlu0 %v520_v26  ;;  %v555_v26 = vld [vmem:[#allocation7 + $0x60] sm:$0xff] }
  0xd7   : > { %1214 = vmatprep.subr.bf16.mxu0 %v1213_v25  ;;  %v1897_v25 = vsub.s32 %v657_v18, %v1844_v28 }
  0xd9   : > { %461 = vadd.xlane.f32.xlu1 %v460_v29  ;;  %v629_v29 = vadd.s32 4294967288, %v1841_v22 }
  0xda   : > { %440 = vadd.xlane.f32.xlu0 %v439_v30  ;;  %v1215_v30 = vpack.c.bf16 %v557_v27, %v555_v26 }
  0xdb   : > { %v1853_v35 = vsub.s32 %v629_v29, %v1844_v28 }
  0xdc   : > { %1216 = vmatpush1.bf16.msra.mxu0 %v1215_v30 }
  0xdd   : > { %503 = vadd.xlane.f32.xlu1 %v502_v33  ;;  %v636_v33 = vadd.s32 4294967280, %v1841_v22 }
  0xde   : > { %482 = vadd.xlane.f32.xlu0 %v481_v34  ;;  %v1850_v34 = vsub.s32 %v1841_v22, %v1844_v28 }
  0xe1   : > { %443 = vadd.xlane.f32.xlu1 %v442_v37 }
  0xe2   : > { %524 = vadd.xlane.f32.xlu0 %v523_v38  ;;  %v1856_v38 = vsub.s32 %v636_v33, %v1844_v28 }
  0xe5   : > { %485 = vadd.xlane.f32.xlu1 %v484_v41 }
  0xe6   : > { %464 = vadd.xlane.f32.xlu0 %v463_v42 }
  0xe9   : > { %527 = vadd.xlane.f32.xlu1 %v526_v45 }
  0xea   : > { %506 = vadd.xlane.f32.xlu0 %v505_v46 }
  0xed   : > { %488 = vadd.xlane.f32.xlu1 %v487_v49  ;;  %v643_v49 = vadd.s32 4294967272, %v1841_v22 }
  0xee   : > { %467 = vadd.xlane.f32.xlu0 %v466_v50 }
  0xef   : > { %v1872_v56 = vsub.s32 %v643_v49, %v1844_v28 }
  0xf1   : > { %530 = vadd.xlane.f32.xlu1 %v529_v53 }
  0xf2   : > { %509 = vadd.xlane.f32.xlu0 %v508_v54 }
  0xf5   : > { %512 = vadd.xlane.f32.xlu1 %v511_v57 }
  0xf6   : > { %491 = vadd.xlane.f32.xlu0 %v490_v58 }
  0xf9   : > { %515 = vadd.xlane.f32.xlu1 %v514_v61 }
  0xfa   : > { %533 = vadd.xlane.f32.xlu0 %v532_v62  ;;  %v650_v62 = vadd.s32 4294967264, %v1841_v22 }
  0xfc   : > { %v1882_v5 = vsub.s32 %v650_v62, %v1844_v28 }
  0xfd   : > { %539 = vadd.xlane.f32.xlu1 %v538_v3 }
  0xfe   : > { %536 = vadd.xlane.f32.xlu0 %v535_v2 }
 0x10e   : > { %v375_v31 = vpop.xlane.xlu1 %374 }
 0x10f   : > { %v351_v32 = vpop.xlane.xlu0 %350  ;;  %v681_v39 = vrot.slane %v375_v31, %v1850_v34 }
 0x110   : > { %v628_v40 = vrot.slane %v351_v32, %v1850_v34 }
 0x112   : > { %v378_v0 = vpop.xlane.xlu1 %377 }
 0x113   : > { %v354_v37 = vpop.xlane.xlu0 %353  ;;  %v685_v41 = vrot.slane %v378_v0, %v1853_v35 }
 0x114   : > { %v633_v42 = vrot.slane %v354_v37, %v1853_v35 }
 0x115   : > { %v686_v43 = vsel %vm634_vm2, %v685_v41, %v681_v39 }
 0x116   : > { %v635_v44 = vsel %vm634_vm2, %v633_v42, %v628_v40  ;;  %v381_v45 = vpop.xlane.xlu1 %380 }
 0x117   : > { %v357_v46 = vpop.xlane.xlu0 %356  ;;  %v690_v47 = vrot.slane %v381_v45, %v1856_v38 }
 0x118   : > { %v640_v48 = vrot.slane %v357_v46, %v1856_v38 }
 0x119   : > { %v691_v50 = vsel %vm641_vm3, %v690_v47, %v686_v43  ;;  %v664_v47 = vadd.s32 4294967248, %v1841_v22 }
 0x11a   : > { %v642_v51 = vsel %vm641_vm3, %v640_v48, %v635_v44  ;;  %v402_v52 = vpop.xlane.xlu1 %401 }
 0x11b   : > { %v399_v53 = vpop.xlane.xlu0 %398  ;;  %v724_v54 = vrot.slane %v402_v52, %v1853_v35 }
 0x11c   : > { %v720_v55 = vrot.slane %v399_v53, %v1850_v34 }
 0x11e   : > { %v725_v57 = vsel %vm634_vm2, %v724_v54, %v720_v55  ;;  %v384_v58 = vpop.xlane.xlu1 %383  ;;  %v1919_v54 = vsub.s32 %v664_v47, %v1844_v28 }
 0x11f   : > { %v360_v59 = vpop.xlane.xlu0 %359  ;;  %v695_v60 = vrot.slane %v384_v58, %v1872_v56 }
 0x120   : > { %v647_v61 = vrot.slane %v360_v59, %v1872_v56 }
 0x121   : > { %v696_v63 = vsel %vm648_vm4, %v695_v60, %v691_v50 }
 0x122   : > { %v649_v1 = vsel %vm648_vm4, %v647_v61, %v642_v51  ;;  %v423_v2 = vpop.xlane.xlu1 %422 }
 0x123   : > { %v405_v3 = vpop.xlane.xlu0 %404  ;;  %v759_v9 = vrot.slane %v423_v2, %v1850_v34 }
 0x124   : > { %v729_v4 = vrot.slane %v405_v3, %v1856_v38 }
 0x126   : > { %v730_v6 = vsel %vm641_vm3, %v729_v4, %v725_v57  ;;  %v363_v7 = vpop.xlane.xlu1 %362  ;;  %v671_v4 = vadd.s32 4294967240, %v1841_v22 }
 0x127   : > { %v426_v8 = vpop.xlane.xlu0 %425  ;;  %v654_v10 = vrot.slane %v363_v7, %v1882_v5 }
 0x128   : > { %v763_v11 = vrot.slane %v426_v8, %v1853_v35  ;;  %v1936_v8 = vsub.s32 %v671_v4, %v1844_v28 }
 0x129   : > { %v656_v12 = vsel %vm655_vm5, %v654_v10, %v649_v1 }
 0x12a   : > { %v764_v13 = vsel %vm634_vm2, %v763_v11, %v759_v9  ;;  %v408_v14 = vpop.xlane.xlu1 %407 }
 0x12b   : > { %v387_v15 = vpop.xlane.xlu0 %386  ;;  %v734_v16 = vrot.slane %v408_v14, %v1872_v56 }
 0x12c   : > { %v700_v17 = vrot.slane %v387_v15, %v1882_v5 }
 0x12d   : > { %v735_v19 = vsel %vm648_vm4, %v734_v16, %v730_v6 }
 0x12e   : > { %v701_v20 = vsel %vm655_vm5, %v700_v17, %v696_v63  ;;  %v447_v21 = vpop.xlane.xlu1 %446 }
 0x12f   : > { %v429_v23 = vpop.xlane.xlu0 %428  ;;  %v798_v30 = vrot.slane %v447_v21, %v1850_v34 }
 0x130   : > { %v768_v24 = vrot.slane %v429_v23, %v1856_v38 }
 0x132   : > { %v769_v26 = vsel %vm641_vm3, %v768_v24, %v764_v13  ;;  %v366_v27 = vpop.xlane.xlu1 %365 }
 0x133   : > { %v450_v29 = vpop.xlane.xlu0 %449  ;;  %v661_v31 = vrot.slane %v366_v27, %v1897_v25 }
 0x134   : > { %v802_v32 = vrot.slane %v450_v29, %v1853_v35 }
 0x135   : > { %v663_v33 = vsel %vm662_vm6, %v661_v31, %v656_v12 }
 0x136   : > { %v803_v36 = vsel %vm634_vm2, %v802_v32, %v798_v30  ;;  %v411_v0 = vpop.xlane.xlu1 %410 }
 0x137   : > { %v390_v37 = vpop.xlane.xlu0 %389  ;;  %v739_v39 = vrot.slane %v411_v0, %v1882_v5 }
 0x138   : > { %v705_v40 = vrot.slane %v390_v37, %v1897_v25 }
 0x139   : > { %v740_v41 = vsel %vm655_vm5, %v739_v39, %v735_v19 }
 0x13a   : > { %v706_v42 = vsel %vm662_vm6, %v705_v40, %v701_v20  ;;  %v453_v43 = vpop.xlane.xlu1 %452 }
 0x13b   : > { %v432_v44 = vpop.xlane.xlu0 %431  ;;  %v807_v45 = vrot.slane %v453_v43, %v1856_v38 }
 0x13c   : > { %v773_v46 = vrot.slane %v432_v44, %v1872_v56 }
 0x13d   : > { %v1913_v48 = vsel %vm641_vm3, %v807_v45, %v803_v36 }
 0x13e   : > { %v774_v49 = vsel %vm648_vm4, %v773_v46, %v769_v26  ;;  %v474_v50 = vpop.xlane.xlu1 %473 }
 0x13f   : > { %v471_v51 = vpop.xlane.xlu0 %470  ;;  %v841_v52 = vrot.slane %v474_v50, %v1853_v35 }
 0x140   : > { %v837_v53 = vrot.slane %v471_v51, %v1850_v34 }
 0x142   : > { %v1922_v55 = vsel %vm634_vm2, %v841_v52, %v837_v53  ;;  %v393_v57 = vpop.xlane.xlu1 %392 }
 0x143   : > { %v369_v58 = vpop.xlane.xlu0 %368  ;;  %v710_v59 = vrot.slane %v393_v57, %v1919_v54 }
 0x144   : > { %v668_v60 = vrot.slane %v369_v58, %v1919_v54 }
 0x145   : > { %v711_v61 = vsel %vm669_vm7, %v710_v59, %v706_v42 }
 0x146   : > { %v670_v62 = vsel %vm669_vm7, %v668_v60, %v663_v33  ;;  %v435_v63 = vpop.xlane.xlu1 %434 }
 0x147   : > { %v414_v1 = vpop.xlane.xlu0 %413  ;;  %v778_v0 = vrot.slane %v435_v63, %v1882_v5 }
 0x148   : > { %v744_v21 = vrot.slane %v414_v1, %v1897_v25 }
 0x14a   : > { %v1928_v2 = vpop.xlane.xlu1 %476  ;;  %v745_v27 = vsel %vm662_vm6, %v744_v21, %v740_v41  ;;  %v779_v41 = vsel %vm655_vm5, %v778_v0, %v774_v49 }
 0x14b   : > { %v456_v3 = vpop.xlane.xlu0 %455 }
 0x14c   : > { %v812_v57 = vrot.slane %v456_v3, %v1872_v56 }
 0x14e   : > { %v1931_v6 = vpop.xlane.xlu1 %497 }
 0x14f   : > { %v1933_v7 = vpop.xlane.xlu0 %494  ;;  %v880_v21 = vrot.slane %v1931_v6, %v1853_v35 }
 0x152   : > { %v396_v9 = vpop.xlane.xlu1 %395 }
 0x153   : > { %v372_v10 = vpop.xlane.xlu0 %371  ;;  %v715_v11 = vrot.slane %v396_v9, %v1936_v8 }
 0x154   : > { %v675_v12 = vrot.slane %v372_v10, %v1936_v8  ;;  %v846_v10 = vrot.slane %v1928_v2, %v1856_v38  ;;  %v876_v2 = vrot.slane %v1933_v7, %v1850_v34 }
 0x155   : > { %v716_v13 = vsel %vm676_vm8, %v715_v11, %v711_v61 }
 0x156   : > { %v677_v14 = vsel %vm676_vm8, %v675_v12, %v670_v62  ;;  %v438_v15 = vpop.xlane.xlu1 %437  ;;  %v813_v62 = vsel %vm648_vm4, %v812_v57, %v1913_v48  ;;  %v881_v7 = vsel %vm634_vm2, %v880_v21, %v876_v2 }
 0x157   : > { %v952_v22 = vsel %vm951_vm9, %v716_v13, %v677_v14  ;;  %v417_v16 = vpop.xlane.xlu0 %416  ;;  %v783_v40 = vrot.slane %v438_v15, %v1897_v25 }
 0x158   : > { %v749_v23 = vrot.slane %v417_v16, %v1919_v54 }
 0x159   : > { %v784_v45 = vsel %vm662_vm6, %v783_v40, %v779_v41 }
 0x15a   : > { %v480_v17 = vpop.xlane.xlu1 %479  ;;  %v750_v30 = vsel %vm669_vm7, %v749_v23, %v745_v27 }
 0x15b   : > { %v459_v18 = vpop.xlane.xlu0 %458  ;;  %v851_v12 = vrot.slane %v480_v17, %v1872_v56 }
 0x15c   : > { %v817_v58 = vrot.slane %v459_v18, %v1882_v5  ;;  %v847_v18 = vsel %vm641_vm3, %v846_v10, %v1922_v55 }
 0x15d   : > { %v852_v23 = vsel %vm648_vm4, %v851_v12, %v847_v18 }
 0x15e   : > { %v1942_v19 = vpop.xlane.xlu1 %518  ;;  %v818_v63 = vsel %vm655_vm5, %v817_v58, %v813_v62 }
 0x15f   : > { %v1944_v20 = vpop.xlane.xlu0 %500 }
 0x162   : > { %v420_v24 = vpop.xlane.xlu1 %419 }
 0x163   : > { %v1948_v26 = vpop.xlane.xlu0 %521  ;;  %v754_v29 = vrot.slane %v420_v24, %v1936_v8  ;;  %v885_v24 = vrot.slane %v1944_v20, %v1856_v38 }
 0x165   : > { %v755_v31 = vsel %vm676_vm8, %v754_v29, %v750_v30  ;;  %v886_v40 = vsel %vm641_vm3, %v885_v24, %v881_v7 }
 0x166   : > { %v954_v32 = vsel %vm953_vm10, %v755_v31, %v952_v22  ;;  %v462_v33 = vpop.xlane.xlu1 %461 }
 0x167   : > { %v441_v36 = vpop.xlane.xlu0 %440  ;;  %v822_v60 = vrot.slane %v462_v33, %v1897_v25 }
 0x168   : > { %v788_v42 = vrot.slane %v441_v36, %v1919_v54  ;;  %v915_v36 = vrot.slane %v1942_v19, %v1850_v34 }
 0x169   : > { %v823_v9 = vsel %vm662_vm6, %v822_v60, %v818_v63  ;;  %v1044_v63 = vsub.s32 0, %v1844_v28 }
 0x16a   : > { %v1955_v37 = vpop.xlane.xlu1 %503  ;;  %v789_v47 = vsel %vm669_vm7, %v788_v42, %v784_v45 }
 0x16b   : > { %v483_v39 = vpop.xlane.xlu0 %482  ;;  %v890_v55 = vrot.slane %v1955_v37, %v1872_v56 }
 0x16c   : > { %v856_v48 = vrot.slane %v483_v39, %v1882_v5 }
 0x16d   : > { %v891_v45 = vsel %vm648_vm4, %v890_v55, %v886_v40 }
 0x16e   : > { %v444_v43 = vpop.xlane.xlu1 %443  ;;  %v857_v27 = vsel %vm655_vm5, %v856_v48, %v852_v23 }
 0x16f   : > { %v1960_v44 = vpop.xlane.xlu0 %524  ;;  %v793_v46 = vrot.slane %v444_v43, %v1936_v8 }
 0x170   : > { %v924_v0 = vrot.slane %v1960_v44, %v1856_v38 }
 0x171   : > { %v794_v50 = vsel %vm676_vm8, %v793_v46, %v789_v47 }
 0x172   : > { %v956_v51 = vsel %vm955_vm11, %v794_v50, %v954_v32  ;;  %v486_v52 = vpop.xlane.xlu1 %485  ;;  %v919_v32 = vrot.slane %v1948_v26, %v1853_v35 }
 0x173   : > { %v465_v53 = vpop.xlane.xlu0 %464  ;;  %v861_v16 = vrot.slane %v486_v52, %v1897_v25 }
 0x174   : > { %v827_v61 = vrot.slane %v465_v53, %v1919_v54  ;;  %v920_v38 = vsel %vm634_vm2, %v919_v32, %v915_v36 }
 0x175   : > { %v862_v31 = vsel %vm662_vm6, %v861_v16, %v857_v27  ;;  %v925_v47 = vsel %vm641_vm3, %v924_v0, %v920_v38 }
 0x176   : > { %v528_v49 = vpop.xlane.xlu1 %527  ;;  %v828_v11 = vsel %vm669_vm7, %v827_v61, %v823_v9  ;;  %v542_v9 = vld [vmem:[%s1707_s14 + $0x8] sm:$0xff] }
 0x177   : > { %v507_v59 = vpop.xlane.xlu0 %506  ;;  %v929_v42 = vrot.slane %v528_v49, %v1872_v56 }
 0x178   : > { %v895_v33 = vrot.slane %v507_v59, %v1882_v5 }
 0x179   : > { %v930_v50 = vsel %vm648_vm4, %v929_v42, %v925_v47 }
 0x17a   : > { %v489_v1 = vpop.xlane.xlu1 %488  ;;  %v896_v44 = vsel %vm655_vm5, %v895_v33, %v891_v45 }
 0x17b   : > { %v468_v4 = vpop.xlane.xlu0 %467  ;;  %v866_v17 = vrot.slane %v489_v1, %v1919_v54  ;;  %v541_v1 = vld [vmem:[%s1707_s14] sm:$0xff] }
 0x17c   : > { %v832_v3 = vrot.slane %v468_v4, %v1936_v8 }
 0x17d   : > { %v867_v20 = vsel %vm669_vm7, %v866_v17, %v862_v31 }
 0x17e   : > { %v833_v13 = vsel %vm676_vm8, %v832_v3, %v828_v11  ;;  %v531_v22 = vpop.xlane.xlu1 %530 }
 0x17f   : > { %v958_v14 = vsel %vm957_vm12, %v833_v13, %v956_v51  ;;  %v510_v15 = vpop.xlane.xlu0 %509  ;;  %v934_v34 = vrot.slane %v531_v22, %v1882_v5 }
 0x180   : > { %v900_v37 = vrot.slane %v510_v15, %v1897_v25 }
 0x181   : > { %v935_v5 = vsel %vm655_vm5, %v934_v34, %v930_v50 }
 0x182   : > { %v513_v29 = vpop.xlane.xlu1 %512  ;;  %v901_v56 = vsel %vm662_vm6, %v900_v37, %v896_v44 }
 0x183   : > { %v492_v30 = vpop.xlane.xlu0 %491  ;;  %v905_v35 = vrot.slane %v513_v29, %v1919_v54 }
 0x184   : > { %v871_v6 = vrot.slane %v492_v30, %v1936_v8 }
 0x185   : > { %v906_v51 = vsel %vm669_vm7, %v905_v35, %v901_v56 }
 0x186   : > { %v872_v39 = vsel %vm676_vm8, %v871_v6, %v867_v20  ;;  %v516_v41 = vpop.xlane.xlu1 %515 }
 0x187   : > { %v960_v26 = vsel %vm959_vm13, %v872_v39, %v958_v14  ;;  %v534_v43 = vpop.xlane.xlu0 %533  ;;  %v910_v19 = vrot.slane %v516_v41, %v1936_v8 }
 0x188   : > { %v939_v46 = vrot.slane %v534_v43, %v1897_v25 }
 0x189   : > { %v911_v57 = vsel %vm676_vm8, %v910_v19, %v906_v51 }
 0x18a   : > { %v540_v53 = vpop.xlane.xlu1 %539  ;;  %v940_v49 = vsel %vm662_vm6, %v939_v46, %v935_v5  ;;  %v962_v61 = vsel %vm961_vm14, %v911_v57, %v960_v26 }
 0x18b   : > { %v537_v52 = vpop.xlane.xlu0 %536  ;;  %v949_v25 = vrot.slane %v540_v53, %v1936_v8  ;;  %v1048_v8 = vsub.s32 1, %v1844_v28 }
 0x18c   : > { %v944_v58 = vrot.slane %v537_v52, %v1919_v54  ;;  %v1040_v54 = vld [vmem:[%s2090_s4] sm:$0x3] }
 0x18d   : > { %v1045_v4 = vrot.slane %v1040_v54, %v1044_v63  ;;  %v1049_v10 = vrot.slane %v1040_v54, %v1048_v8 }
 0x18e   : > { %v945_v59 = vsel %vm669_vm7, %v944_v58, %v940_v49 }
 0x18f   : > { %v950_v60 = vsel %vm676_vm8, %v949_v25, %v945_v59 }
 0x190   : > { %v964_v62 = vsel %vm963_vm15, %v950_v60, %v962_v61 }
 0x191   : > { %1190 = vmatmul.mubr.msk.f32.vlgmr.msra.gmra.mrb[0].mxu0 %vm348_vm1, %v964_v62 }
 0x264   : > { %v1033_v3 = vpop.f32.mrb[0].mxu0 }
 0x265   : > { %v1038_v11 = vadd.f32 %v1033_v3, %v541_v1  ;;  %v1035_v12 = vpop.f32.mrb[1].mxu0 }
 0x266   : > { %v1039_v13 = vadd.f32 %v1035_v12, %v542_v9 }
 0x267   : > { %v1052_v48 = vadd.f32 %v1045_v4, %v1038_v11 }
 0x268   : > { %v1053_v14 = vadd.f32 %v1049_v10, %v1039_v13 }
 0x269   : > { %1054 = vst [vmem:[%s1707_s14] sm:$0xff] %v1052_v48 }
 0x26a   : > { %1055 = vst [vmem:[%s1707_s14 + $0x8] sm:$0xff] %v1053_v14 }
 0x26b   : > { %1407 = shalt.err (!%p1404_p12)
}
 0x26c   : > { %s1408_s20 = scalar_lea.hbm %s2041_s7, 256  ;;  %s1412_s21 = scalar_lea.hbm %s2091_s5, 768 }
 0x26d   : > { %p1409_p1 = scmp.ne.s32.totalorder %s2041_s7, %s1408_s20  ;;  %p1413_p13 = scmp.lt.u32.totalorder %s2041_s7, %s2091_s5 }
 0x26e   : > { %p1414_p0 = scmp.lt.u32.totalorder %s1412_s21, %s1408_s20  ;;  %p1416_p5 = scmp.lt.u32.totalorder %s1408_s20, %s2041_s7 }
 0x26f   : > { %p1410_p3 = pnand %p1409_p1, %p1640_p7 }
 0x270   : > { %p1415_p4 = por %p1414_p0, %p1413_p13 }
 0x271   : > { %p1411_p8 = pneg %p1410_p3 }
 0x272   : > { %p1417_p9 = por %p1416_p5, %p1415_p4 }
 0x274   : > { %p1418_p11 = pnand %p1417_p9, %p1411_p8 }
 0x276   : > { %1421 = shalt.err (!%p1418_p11)
}
 0x277   : > { %1227 = dma.vmem_to_hbm [thread:$0]  (%p1640_p7), %s2043_s19, 256, %s2041_s7, %s1057_s15  }
 0x278 PF: > { %p1249_p2 = scmp.ge.s32.totalorder %s1470_s6, 2  ;;  %s1083_s23 = sand.u32 1, %s1458_s28  }
 0x279   : > { %p2106_p6 = scmp.ne.s32.totalorder %s2096_s9, 0  ;;  %s1084_s17 = scalar_lea.sflag [#allocation6], %s1083_s23 }
 0x27b   : > { %p1241_p10 = pnand %p1249_p2, %p2106_p6 }
 0x27d   : > { %1453 = dma.done.wait (!%p1241_p10), %s1084_s17, 256  }
 0x27e   : > { %1455 = vsyncadd (!%p1241_p10), %s1084_s17, 4294967040  ;;  %p23_p12 = scmp.ge.s32.totalorder %s1630_s22, 5   ;;  %s2107_s28 = smov %s1462_s29 }
 0x27f   : > { %s2108_s29 = smov %s1466_s30  ;;  %s2109_s30 = smov %s1646_s27 }
 0x280   : > { %s2110_s6 = smov %s1630_s22  ;;  %25 = sbr.rel (!%p23_p12) target bundleno = 18 (0x12), region = 109 }
 0x287   :  { %1089 = vsyncpa [#allocation5], 1 }
 0x288   :  { %1091 = vsyncpa [#allocation5 + $0x1], 1 }
 0x289   :  { %1092 = vsyncpa [#allocation8], 1 }
 0x28a   :  { %1093 = vsyncpa [#allocation6], 1 }
 0x28b   :  { %1095 = vsyncpa [#allocation6 + $0x1], 1 }

</bundles_post_ra>
